<compile_context>
chip_gen: v5e
topology: v5e:2x2
jax: 0.10.0
libtpu: 0.0.40
codegen_flags: <defaults>
</compile_context>

<pallas_src>
import functools
import math

import jax
import jax.numpy as jnp
from jax.experimental import pallas as pl
from jax.experimental.pallas import tpu as pltpu


def _round_up(v, m):
    return ((v + m - 1) // m) * m


def _linear_kernel(x_ref, w_ref, b_ref, o_ref):
    # x_ref: (TR, fold*K)        streamed folded input rows
    # w_ref: (fold*K, fold*N)    block-diagonal expanded weight (VMEM-resident)
    # b_ref: (1, fold*N)         f32 bias (VMEM-resident)
    # o_ref: (TR, fold*N)        lane-dense output tile
    acc = jnp.dot(x_ref[...], w_ref[...], preferred_element_type=jnp.float32)
    o_ref[...] = (acc + b_ref[...]).astype(o_ref.dtype)


# VMEM budgets (bytes).  The x/out streams are double-buffered by BlockSpec
# pipelining, so _STREAM_VMEM_BUDGET already includes the 2x factor; the
# resident expanded weight is capped separately.  Total stays well under the
# 40 MiB scoped limit we request, which is below v7x's 64 MiB physical VMEM
# and far below v5e/v6e's 128 MiB (v5e's DEFAULT scoped limit is only 16 MiB,
# hence the explicit request).
_STREAM_VMEM_BUDGET = 24 << 20   # double-buffered x-tile + out-tile bytes
_WEIGHT_VMEM_BUDGET = 2 << 20    # resident expanded-weight bytes
_VMEM_LIMIT_BYTES = 40 << 20
_TR_TARGET = 4096                # folded rows / grid step (amortize ~0.35us/step)


@functools.partial(jax.jit, static_argnames=("batch_first",))
def time_distributed_linear(x, w, b, batch_first=True):
    """TimeDistributed(Linear): y = x @ w.T + b applied to every row of x.

    x: (..., n_features); if rank <= 2, plain linear; else flatten leading dims.
    w: (adapter_dim, n_features)
    b: (adapter_dim,)
    """
    orig_shape = x.shape
    K = x.shape[-1]
    N = w.shape[0]
    x_it = jnp.dtype(x.dtype).itemsize
    w_it = jnp.dtype(w.dtype).itemsize

    x_flat = x.reshape(-1, K)                 # free reshape (contiguous)
    M = x_flat.shape[0]

    # ---- fold: MINIMAL factor making the output last dim a multiple of 128
    # lanes (unmasked lane-dense stores), with a resident-weight size guard.
    if N % 128 == 0:
        fold = 1
    else:
        fold = 128 // math.gcd(N, 128)
        if (fold * K) * (fold * N) * w_it > _WEIGHT_VMEM_BUDGET:
            # TODO(synk): lane-sparse fallback for very large K*N; correct but
            # pays masked (<128-lane) output stores.
            fold = 1

    Kf, Nf = fold * K, fold * N

    # ---- fold rows into lanes (free, contiguity-preserving reshape) ----
    Mf = -(-M // fold)                        # ceil(M / fold)
    M_fold = Mf * fold
    if M_fold != M:
        # Corner case only (M not divisible by fold): tiny tail pad.  This is
        # the only path that costs an extra HBM pass over x (and y below).
        x_flat = jnp.pad(x_flat, ((0, M_fold - M), (0, 0)))
    x2 = x_flat.reshape(Mf, Kf)

    if fold > 1:
        # W2[i*K + k, i*N + n] = w[n, k]  (block-diagonal), so that
        # (x2 @ W2)[r, i*N + n] == (x_flat @ w.T)[fold*r + i, n].
        w2 = jnp.kron(jnp.eye(fold, dtype=w.dtype), w.T)
        b2 = jnp.tile(b, fold).astype(jnp.float32).reshape(1, Nf)
    else:
        w2 = w.T                              # tiny, built once per call
        b2 = b.astype(jnp.float32).reshape(1, Nf)

    # ---- row tile: as large as the stream budget allows, capped so the
    # "parallel" grid axis keeps >=2 steps (both v7x TensorCores busy).
    row_bytes = (Kf + Nf) * x_it
    tr_vmem = max(8, (_STREAM_VMEM_BUDGET // (2 * row_bytes)) // 8 * 8)
    tr = min(_TR_TARGET, tr_vmem)
    if Mf <= 8:
        tr = Mf                               # block == full dim (layout-legal)
    else:
        tr = min(tr, _round_up(Mf, 8))        # don't exceed the array
        if Mf > 16:
            tr = min(tr, _round_up(-(-Mf // 2), 8))   # keep >=2 grid steps
        tr = max(8, (tr // 8) * 8)

    grid = (pl.cdiv(Mf, tr),)

    cost = pl.CostEstimate(
        flops=2 * Mf * Kf * Nf,               # actual MXU flops (fold-inflated)
        transcendentals=0,
        bytes_accessed=x_it * (Mf * Kf + Mf * Nf) + w_it * Kf * Nf,
    )

    y2 = pl.pallas_call(
        _linear_kernel,
        out_shape=jax.ShapeDtypeStruct((Mf, Nf), x.dtype),
        grid_spec=pltpu.PrefetchScalarGridSpec(
            num_scalar_prefetch=0,
            grid=grid,
            in_specs=[
                pl.BlockSpec((tr, Kf), lambda i: (i, 0)),   # streamed rows
                pl.BlockSpec((Kf, Nf), lambda i: (0, 0)),   # resident weight
                pl.BlockSpec((1, Nf), lambda i: (0, 0)),    # resident bias
            ],
            out_specs=pl.BlockSpec((tr, Nf), lambda i: (i, 0)),
        ),
        compiler_params=pltpu.CompilerParams(
            dimension_semantics=("parallel",),
            vmem_limit_bytes=_VMEM_LIMIT_BYTES,
        ),
        cost_estimate=cost,
    )(x2, w2, b2)

    # Unfold lanes back to rows (free contiguous reshape; no trailing copy in
    # the common M % fold == 0 case).
    y_flat = y2.reshape(M_fold, N)
    if M_fold != M:
        y_flat = y_flat[:M]                   # corner-case tail drop only

    if len(orig_shape) <= 2:
        return y_flat.reshape(orig_shape[:-1] + (N,))
    if batch_first:
        # y.view(x.size(0), -1, y.size(-1))
        return y_flat.reshape(orig_shape[0], -1, N)
    # y.view(-1, x.size(1), y.size(-1))
    return y_flat.reshape(-1, orig_shape[1], N)


if __name__ == "__main__":
    # Module config (synthetic, deterministic init).
    n_tokens = 8       # timesteps
    n_features = 32
    adapter_dim = 16
    batch = 2

    key = jax.random.PRNGKey(0)
    kx, kw, kb = jax.random.split(key, 3)

    # x: (samples, timesteps, n_features)  -- batch_first=True
    x = jax.random.normal(kx, (batch, n_tokens, n_features), dtype=jnp.float32)
    # torch.nn.Linear params: weight (adapter_dim, n_features), bias (adapter_dim,)
    w = jax.random.normal(kw, (adapter_dim, n_features), dtype=jnp.float32) * 0.05
    b = jax.random.normal(kb, (adapter_dim,), dtype=jnp.float32) * 0.05

    y = time_distributed_linear(x, w, b, batch_first=True)
    y = jax.block_until_ready(y)

    # Reference check in plain JAX.
    y_ref = (x.reshape(-1, n_features) @ w.T + b).reshape(batch, -1, adapter_dim)
    assert y.shape == (batch, n_tokens, adapter_dim), y.shape
    assert jnp.allclose(y, y_ref, atol=1e-5, rtol=1e-5), float(
        jnp.max(jnp.abs(y - y_ref)))

    print("KERNEL_OK")
</pallas_src>

<mosaic_0001>
module attributes {stable_mosaic.version = 11 : i64} {
  func.func @_linear_kernel(%arg0: i32, %arg1: memref<2x256xf32, #tpu.memory_space<vmem>>, %arg2: memref<256x128xf32, #tpu.memory_space<vmem>>, %arg3: memref<1x128xf32, #tpu.memory_space<vmem>>, %arg4: memref<2x128xf32, #tpu.memory_space<vmem>>) attributes {dimension_semantics = [#tpu.dimension_semantics<parallel>], iteration_bounds = array<i64: 1>, scalar_prefetch = 0 : i64, scratch_operands = 0 : i64, tpu.core_type = #tpu.core_type<tc>, window_params = [{transform_indices = @transform_0, window_bounds = array<i64: 2, 256>}, {pipeline_mode = #tpu.pipeline_mode<synchronous>, transform_indices = @transform_1, window_bounds = array<i64: 256, 128>}, {pipeline_mode = #tpu.pipeline_mode<synchronous>, transform_indices = @transform_2, window_bounds = array<i64: 1, 128>}, {transform_indices = @transform_3, window_bounds = array<i64: 2, 128>}]} {
    %c0 = arith.constant 0 : index
    %c0_0 = arith.constant 0 : index
    %0 = vector.load %arg1[%c0, %c0_0] : memref<2x256xf32, #tpu.memory_space<vmem>>, vector<2x256xf32>
    %c0_1 = arith.constant 0 : index
    %c0_2 = arith.constant 0 : index
    %1 = vector.load %arg2[%c0_1, %c0_2] : memref<256x128xf32, #tpu.memory_space<vmem>>, vector<256x128xf32>
    %cst = arith.constant dense<0.000000e+00> : vector<2x128xf32>
    %2 = tpu.matmul %0, %1, %cst {dimension_numbers = #tpu.dot_dimension_numbers<[1], [0], [0], [1], [0, 0, 1, 1], [], []>} : vector<2x256xf32>, vector<256x128xf32>, vector<2x128xf32> -> vector<2x128xf32>
    %c0_3 = arith.constant 0 : index
    %c0_4 = arith.constant 0 : index
    %3 = vector.load %arg3[%c0_3, %c0_4] : memref<1x128xf32, #tpu.memory_space<vmem>>, vector<1x128xf32>
    %4 = vector.broadcast %3 : vector<1x128xf32> to vector<2x128xf32>
    %5 = arith.addf %2, %4 : vector<2x128xf32>
    %c0_5 = arith.constant 0 : index
    %c0_6 = arith.constant 0 : index
    %6 = vector.load %arg4[%c0_5, %c0_6] : memref<2x128xf32, #tpu.memory_space<vmem>>, vector<2x128xf32>
    tpu.vector_store %arg4[%c0_5, %c0_6], %5 {strides = array<i32>} : memref<2x128xf32, #tpu.memory_space<vmem>>, vector<2x128xf32>,
    return
  }
  func.func @transform_0(%arg0: i32) -> (i32, i32) {
    %c0_i32 = arith.constant 0 : i32
    %c0_i32_0 = arith.constant 0 : i32
    return %arg0, %c0_i32 : i32, i32
  }
  func.func @transform_1(%arg0: i32) -> (i32, i32) {
    %c0_i32 = arith.constant 0 : i32
    %c0_i32_0 = arith.constant 0 : i32
    %c0_i32_1 = arith.constant 0 : i32
    return %c0_i32, %c0_i32_0 : i32, i32
  }
  func.func @transform_2(%arg0: i32) -> (i32, i32) {
    %c0_i32 = arith.constant 0 : i32
    %c0_i32_0 = arith.constant 0 : i32
    %c0_i32_1 = arith.constant 0 : i32
    return %c0_i32, %c0_i32_0 : i32, i32
  }
  func.func @transform_3(%arg0: i32) -> (i32, i32) {
    %c0_i32 = arith.constant 0 : i32
    %c0_i32_0 = arith.constant 0 : i32
    return %arg0, %c0_i32 : i32, i32
  }
}

</mosaic_0001>

<bundles_post_ra>
// kernel: tile.8
= control target key start
LH: loop header
LB: loop body
LE: loop exit
PB: predicated region body
PF: predicated region fallthrough
CT: control target
= control target key end

     0   :  { %s22_s0 = inlined_call_operand.vmem [shape: f32[16], index: 0, kind: input, shape index: {}]   ;;  %s23_s1 = inlined_call_operand.vmem [shape: f32[8,16], index: 1, kind: output, shape index: {}]  }
   0x1   :  { %v4_v0 = vld [vmem:[%s22_s0] ss:$0 sm:$0xff] }
   0x2   :  { %5 = vst [vmem:[%s23_s1] sm:$0xff] %v4_v0 }

// kernel: tile.9
= control target key start
LH: loop header
LB: loop body
LE: loop exit
PB: predicated region body
PF: predicated region fallthrough
CT: control target
= control target key end

     0   :  { %s67_s10 = smov 112   ;;  %s68_s11 = smov 80   ;;  %vm3_vm0 = vcmask 130048   ;;  %vm9_vm1 = vcmask 1048448   ;;  %vm15_vm2 = vcmask 917248   ;;  %vm21_vm3 = vcmask 786048   ;;  %s111_s0 = inlined_call_operand.vmem [shape: f32[8,16], index: 0, kind: input, shape index: {}]   ;;  %s112_s1 = inlined_call_operand.vmem [shape: f32[1,128], index: 1, kind: output, shape index: {}]  }
   0x1   :  { %v53_v0 = vld [vmem:[%s111_s0 + $0x7] sm:$0x1]   ;;  %v55_v1 = vld [vmem:[%s111_s0 + $0x5] sm:$0x1]   ;;  %v57_v2 = vld [vmem:[%s111_s0 + $0x3] sm:$0x1]  }
   0x2   :  { %7 = vrot.lane.b32.xlu0 %v53_v0, %s67_s10  ;;  %19 = vrot.lane.b32.xlu1 %v55_v1, %s68_s11  ;;  %s69_s14 = smov 48   ;;  %v54_v3 = vld [vmem:[%s111_s0 + $0x6] sm:$0x1]   ;;  %v56_v4 = vld [vmem:[%s111_s0 + $0x4] sm:$0x1]   ;;  %s70_s21 = smov 96  }
   0x3   :  { %31 = vrot.lane.b32.xlu2 %v57_v2, %s69_s14  ;;  %v58_v5 = vld [vmem:[%s111_s0 + $0x2] sm:$0x1]   ;;  %s71_s22 = smov 64   ;;  %s72_s23 = smov 32   ;;  %v59_v6 = vld [vmem:[%s111_s0 + $0x1] sm:$0x1]  }
   0x4   :  { %s73_s26 = smov 16   ;;  %v2_v7 = vld [vmem:[%s111_s0] sm:$0x1]   ;;  %vm27_vm4 = vcmask 654848   ;;  %vm33_vm5 = vcmask 523648   ;;  %vm39_vm6 = vcmask 392448  }
   0x5   :  { %4 = vst.msk [vmem:[#allocation0] sm:$0x1] %vm3_vm0, %v2_v7   ;;  %vm45_vm7 = vcmask 261248  }
   0xa   :  { %13 = vrot.lane.b32.xlu0 %v54_v3, %s70_s21  ;;  %25 = vrot.lane.b32.xlu1 %v56_v4, %s71_s22 }
   0xb   :  { %37 = vrot.lane.b32.xlu2 %v58_v5, %s72_s23 }
  0x12   :  { %43 = vrot.lane.b32.xlu0 %v59_v6, %s73_s26 }
  0x5d   :  { %v32_v8 = vpop.permute.xlu2 %31  }
  0x65   :  { %v38_v9 = vpop.permute.xlu2 %37  }
  0x74   :  { %v8_v10 = vpop.permute.xlu0 %7   ;;  %v20_v11 = vpop.permute.xlu1 %19  }
  0x75   :  { %10 = vst.msk [vmem:[#allocation0] sm:$0x1] %vm9_vm1, %v8_v10  }
  0x7c   :  { %v14_v12 = vpop.permute.xlu0 %13   ;;  %v26_v13 = vpop.permute.xlu1 %25  }
  0x7d   :  { %16 = vst.msk [vmem:[#allocation0] sm:$0x1] %vm15_vm2, %v14_v12  }
  0x7e   :  { %22 = vst.msk [vmem:[#allocation0] sm:$0x1] %vm21_vm3, %v20_v11  }
  0x7f   :  { %28 = vst.msk [vmem:[#allocation0] sm:$0x1] %vm27_vm4, %v26_v13  }
  0x80   :  { %34 = vst.msk [vmem:[#allocation0] sm:$0x1] %vm33_vm5, %v32_v8  }
  0x81   :  { %40 = vst.msk [vmem:[#allocation0] sm:$0x1] %vm39_vm6, %v38_v9  }
  0x84   :  { %v44_v14 = vpop.permute.xlu0 %43  }
  0x85   :  { %46 = vst.msk [vmem:[#allocation0] sm:$0x1] %vm45_vm7, %v44_v14  }
  0x8c   :  { %v49_v15 = vld [vmem:[#allocation0] sm:$0x1] }
  0x8d   :  { %52 = vst [vmem:[%s112_s1] sm:$0x1] %v49_v15 }

// kernel: time_distributed_linear.1
= control target key start
LH: loop header
LB: loop body
LE: loop exit
PB: predicated region body
PF: predicated region fallthrough
CT: control target
= control target key end

     0   :  { %s228_s1 = inlined_call_operand.vmem [shape: f32[256,128], index: 1, kind: input, shape index: {}]   ;;  %s229_s0 = inlined_call_operand.vmem [shape: f32[2,256], index: 0, kind: input, shape index: {}]   ;;  %s230_s2 = inlined_call_operand.vmem [shape: f32[1,128], index: 2, kind: input, shape index: {}]   ;;  %s231_s3 = inlined_call_operand.vmem [shape: f32[2,128], index: 3, kind: output, shape index: {}]  }
   0x1   :  { %v30_v0 = vld [vmem:[%s228_s1 + $0x78] sm:$0xff]  ;;  %v29_v1 = vld [vmem:[%s228_s1 + $0x70] sm:$0xff]  ;;  %v28_v4 = vld [vmem:[%s228_s1 + $0x68] sm:$0xff] }
   0x2   :  { %v46_v2 = vld [vmem:[%s228_s1 + $0xf8] sm:$0xff]  ;;  %57 = vmatpush.msra.mxu0 %v30_v0  ;;  %v45_v3 = vld [vmem:[%s228_s1 + $0xf0] sm:$0xff]  ;;  %v44_v5 = vld [vmem:[%s228_s1 + $0xe8] sm:$0xff] }
   0x3   :  { %77 = vmatpush.msra.mxu1 %v46_v2  ;;  %v27_v6 = vld [vmem:[%s228_s1 + $0x60] sm:$0xff]  ;;  %v26_v8 = vld [vmem:[%s228_s1 + $0x58] sm:$0xff]  ;;  %v25_v10 = vld [vmem:[%s228_s1 + $0x50] sm:$0xff] }
   0x4   :  { %58 = vmatpush.msra.mxu0 %v29_v1  ;;  %v43_v7 = vld [vmem:[%s228_s1 + $0xe0] sm:$0xff]  ;;  %v42_v9 = vld [vmem:[%s228_s1 + $0xd8] sm:$0xff]  ;;  %v41_v11 = vld [vmem:[%s228_s1 + $0xd0] sm:$0xff] }
   0x5   :  { %78 = vmatpush.msra.mxu1 %v45_v3  ;;  %v24_v12 = vld [vmem:[%s228_s1 + $0x48] sm:$0xff]  ;;  %v14_v14 = vld [vmem:[%s229_s0] sm:$0xf]  ;;  %v22_v17 = vld [vmem:[%s228_s1 + $0x38] sm:$0xff] }
   0x6   :  { %59 = vmatpush.msra.mxu0 %v28_v4  ;;  %v40_v13 = vld [vmem:[%s228_s1 + $0xc8] sm:$0xff]  ;;  %52 = vst [vmem:[#allocation1] ss:$4 sm:$0xff] %v14_v14  ;;  %v23_v15 = vld [vmem:[%s228_s1 + $0x40] sm:$0xff]  ;;  %v38_v18 = vld [vmem:[%s228_s1 + $0xb8] sm:$0xff] }
   0x7   :  { %79 = vmatpush.msra.mxu1 %v44_v5  ;;  %v39_v16 = vld [vmem:[%s228_s1 + $0xc0] sm:$0xff]  ;;  %v21_v19 = vld [vmem:[%s228_s1 + $0x30] sm:$0xff]  ;;  %v20_v21 = vld [vmem:[%s228_s1 + $0x28] sm:$0xff] }
   0x8   :  { %60 = vmatpush.msra.mxu0 %v27_v6  ;;  %v37_v20 = vld [vmem:[%s228_s1 + $0xb0] sm:$0xff]  ;;  %v36_v22 = vld [vmem:[%s228_s1 + $0xa8] sm:$0xff]  ;;  %v19_v23 = vld [vmem:[%s228_s1 + $0x20] sm:$0xff] }
   0x9   :  { %80 = vmatpush.msra.mxu1 %v43_v7  ;;  %v35_v24 = vld [vmem:[%s228_s1 + $0xa0] sm:$0xff]  ;;  %v18_v25 = vld [vmem:[%s228_s1 + $0x18] sm:$0xff]  ;;  %v17_v27 = vld [vmem:[%s228_s1 + $0x10] sm:$0xff] }
   0xa   :  { %61 = vmatpush.msra.mxu0 %v26_v8  ;;  %v34_v26 = vld [vmem:[%s228_s1 + $0x98] sm:$0xff]  ;;  %v33_v28 = vld [vmem:[%s228_s1 + $0x90] sm:$0xff]  ;;  %v16_v29 = vld [vmem:[%s228_s1 + $0x8] sm:$0xff] }
   0xb   :  { %81 = vmatpush.msra.mxu1 %v42_v9  ;;  %v32_v30 = vld [vmem:[%s228_s1 + $0x88] sm:$0xff]  ;;  %v15_v31 = vld [vmem:[%s228_s1] sm:$0xff] }
   0xc   :  { %62 = vmatpush.msra.mxu0 %v25_v10  ;;  %v31_v32 = vld [vmem:[%s228_s1 + $0x80] sm:$0xff] }
   0xd   :  { %82 = vmatpush.msra.mxu1 %v41_v11  ;;  %v53_v33 = vld.sshfl [vmem:[#allocation1] sm:$0xff pattern:$0x73625140]  ;;  %v54_v34 = vld.sshfl [vmem:[#allocation1 + $0x8] sm:$0xff pattern:$0x73625140] }
   0xe   :  { %63 = vmatpush.msra.mxu0 %v24_v12  ;;  %v102_v35 = vld [vmem:[%s230_s2] ss:$0 sm:$0xff] }
   0xf   :  { %83 = vmatpush.msra.mxu1 %v40_v13 }
  0x10   :  { %64 = vmatpush.msra.mxu0 %v23_v15 }
  0x11   :  { %84 = vmatpush.msra.mxu1 %v39_v16 }
  0x12   :  { %65 = vmatpush.msra.mxu0 %v22_v17 }
  0x13   :  { %85 = vmatpush.msra.mxu1 %v38_v18 }
  0x14   :  { %66 = vmatpush.msra.mxu0 %v21_v19 }
  0x15   :  { %86 = vmatpush.msra.mxu1 %v37_v20 }
  0x16   :  { %67 = vmatpush.msra.mxu0 %v20_v21 }
  0x17   :  { %87 = vmatpush.msra.mxu1 %v36_v22 }
  0x18   :  { %68 = vmatpush.msra.mxu0 %v19_v23 }
  0x19   :  { %88 = vmatpush.msra.mxu1 %v35_v24 }
  0x1a   :  { %69 = vmatpush.msra.mxu0 %v18_v25 }
  0x1b   :  { %89 = vmatpush.msra.mxu1 %v34_v26 }
  0x1c   :  { %70 = vmatpush.msra.mxu0 %v17_v27 }
  0x1d   :  { %90 = vmatpush.msra.mxu1 %v33_v28 }
  0x1e   :  { %71 = vmatpush.msra.mxu0 %v16_v29 }
  0x1f   :  { %91 = vmatpush.msra.mxu1 %v32_v30 }
  0x20   :  { %72 = vmatpush.msra.mxu0 %v15_v31 }
  0x21   :  { %92 = vmatpush.msra.mxu1 %v31_v32  ;;  %73 = vmatmul.f32.vlgmr.msra.gmra.mxu0 %v53_v33 }
  0x22   :  { %93 = vmatmul.f32.vlgmr.msra.gmra.mxu1 %v54_v34 }
  0x9e   :  { %v74_v36 = vpop.f32.mrf.mxu0 }
  0x9f   :  { %v94_v37 = vpop.f32.mrf.mxu1  ;;  %v75_v38 = vadd.f32 %v102_v35, %v74_v36 }
  0xa1   :  { %v95_v39 = vadd.f32 %v94_v37, %v75_v38 }
  0xa3   :  { %97 = vst [vmem:[%s231_s3] sm:$0x3] %v95_v39 }

</bundles_post_ra>
